<compile_context>
chip_gen: v7x
topology: tpu7x:2x2x1
jax: 0.10.0
libtpu: 0.0.40
codegen_flags: <defaults>
</compile_context>

<pallas_src>
import jax
import jax.numpy as jnp
from jax.experimental import pallas as pl
from jax.experimental.pallas import tpu as pltpu


_TARGET_TILE_BYTES = 4 << 20  # ~4 MiB/tile; in+out double-buffered ≈ 16 MiB resident
_MAX_LANE_WIDTH = 1024


def _round_up(n, m):
    return ((n + m - 1) // m) * m


def _silu_kernel(x_ref, o_ref):
    # func(x) = x * sigmoid(x).  sigmoid(x) = 0.5 * tanh(x/2) + 0.5 runs the
    # transcendental on the otherwise-idle EUP slot and is numerically stable.
    # Compute in f32: a no-op for f32 inputs, and v5e's VPU/EUP lack bf16 paths.
    x = x_ref[...].astype(jnp.float32)
    sig = 0.5 * jnp.tanh(0.5 * x) + 0.5
    o_ref[...] = (x * sig).astype(o_ref.dtype)


def _lambda_model_pallas(x):
    orig_shape = x.shape
    dtype = x.dtype
    total = x.size
    itemsize = jnp.dtype(dtype).itemsize
    sub = max(8, 32 // itemsize)  # sublane-packing multiple: 8 f32 / 16 bf16 / 32 int8

    # Widest lane width (multiple of 128) that divides the element count, so the
    # slab is a pure reshape (no pad) and every store is full-width & unmasked.
    lane = _MAX_LANE_WIDTH
    while total % lane != 0:
        lane //= 2
    rows = total // lane

    # ~4 MiB tiles, rows rounded to the dtype's sublane-packing multiple.
    tr = max(sub, (_TARGET_TILE_BYTES // (lane * itemsize)) // sub * sub)
    if rows <= tr:
        tr = rows  # single block over the row axis (full-extent dim is always legal)
    grid = pl.cdiv(rows, tr)  # ragged last block handled by Pallas boundary masking

    slab = x.reshape(rows, lane)  # contiguous reshape: bitcast, no HBM copy

    out = pl.pallas_call(
        _silu_kernel,
        out_shape=jax.ShapeDtypeStruct((rows, lane), dtype),
        grid_spec=pl.GridSpec(
            grid=(grid,),
            in_specs=[pl.BlockSpec((tr, lane), lambda i: (i, 0))],
            out_specs=pl.BlockSpec((tr, lane), lambda i: (i, 0)),
        ),
        compiler_params=pltpu.CompilerParams(
            dimension_semantics=("parallel",),
            vmem_limit_bytes=48 << 20,
        ),
    )(slab)

    return out.reshape(orig_shape)


def lambda_model(x, *, min_pallas_bytes=1 << 20, force_pallas=False):
    """LambdaModel(func)(x) with func(x) = x * sigmoid(x), elementwise."""
    nbytes = x.size * x.dtype.itemsize
    if x.size == 0:
        return x
    if not force_pallas and nbytes < min_pallas_bytes:
        # Tiny tensors: pallas_call launch + per-step overhead dominates.
        return x * jax.nn.sigmoid(x)
    if x.size % 128 != 0:
        # Non-lane-aligned element count: a pad+slice wrapper would cost extra
        # full HBM passes, so use the single-pass fused XLA op instead.
        return x * jax.nn.sigmoid(x)
    return _lambda_model_pallas(x)


if __name__ == "__main__":
    key = jax.random.PRNGKey(0)
    # Small NCHW input consistent with a conv-style dataset transform.
    x = jax.random.normal(key, (2, 4, 16, 16), dtype=jnp.float32)

    # Force the Pallas path even at this tiny size so the kernel is exercised.
    y = lambda_model(x, force_pallas=True)
    y = jax.block_until_ready(y)

    y_ref = x * jax.nn.sigmoid(x)
    assert y.shape == x.shape and y.dtype == x.dtype
    assert jnp.max(jnp.abs(y - y_ref)) < 1e-4

    # Larger activation: exercises the tiled / pipelined path (multiple grid steps).
    x_big = jax.random.normal(jax.random.PRNGKey(1), (8, 32, 64, 128), dtype=jnp.float32)
    y_big = jax.block_until_ready(lambda_model(x_big))
    y_big_ref = x_big * jax.nn.sigmoid(x_big)
    assert y_big.shape == x_big.shape and y_big.dtype == x_big.dtype
    assert jnp.max(jnp.abs(y_big - y_big_ref)) < 1e-4

    # Ragged row count (rows not a multiple of the tile rows): boundary-masked grid.
    x_rag = jax.random.normal(jax.random.PRNGKey(2), (3, 5, 24, 128), dtype=jnp.float32)
    y_rag = jax.block_until_ready(lambda_model(x_rag, force_pallas=True))
    assert jnp.max(jnp.abs(y_rag - x_rag * jax.nn.sigmoid(x_rag))) < 1e-4

    print("KERNEL_OK")
</pallas_src>

<mosaic_0001>
module attributes {stable_mosaic.version = 11 : i64} {
  func.func @_silu_kernel(%arg0: i32, %arg1: memref<2x1024xf32, #tpu.memory_space<vmem>>, %arg2: memref<2x1024xf32, #tpu.memory_space<vmem>>) attributes {dimension_semantics = [#tpu.dimension_semantics<parallel>], iteration_bounds = array<i64: 1>, scalar_prefetch = 0 : i64, scratch_operands = 0 : i64, tpu.core_type = #tpu.core_type<tc>, window_params = [{transform_indices = @transform_0, window_bounds = array<i64: 2, 1024>}, {transform_indices = @transform_1, window_bounds = array<i64: 2, 1024>}]} {
    %c0 = arith.constant 0 : index
    %c0_0 = arith.constant 0 : index
    %0 = vector.load %arg1[%c0, %c0_0] : memref<2x1024xf32, #tpu.memory_space<vmem>>, vector<2x1024xf32>
    %cst = arith.constant 5.000000e-01 : f32
    %1 = vector.broadcast %cst : f32 to vector<2x1024xf32>
    %2 = arith.mulf %1, %0 : vector<2x1024xf32>
    %3 = math.tanh %2 : vector<2x1024xf32>
    %cst_1 = arith.constant 5.000000e-01 : f32
    %4 = vector.broadcast %cst_1 : f32 to vector<2x1024xf32>
    %5 = arith.mulf %4, %3 : vector<2x1024xf32>
    %cst_2 = arith.constant 5.000000e-01 : f32
    %6 = vector.broadcast %cst_2 : f32 to vector<2x1024xf32>
    %7 = arith.addf %5, %6 : vector<2x1024xf32>
    %8 = arith.mulf %0, %7 : vector<2x1024xf32>
    %c0_3 = arith.constant 0 : index
    %c0_4 = arith.constant 0 : index
    %9 = vector.load %arg2[%c0_3, %c0_4] : memref<2x1024xf32, #tpu.memory_space<vmem>>, vector<2x1024xf32>
    tpu.vector_store %arg2[%c0_3, %c0_4], %8 {strides = array<i32>} : memref<2x1024xf32, #tpu.memory_space<vmem>>, vector<2x1024xf32>,
    return
  }
  func.func @transform_0(%arg0: i32) -> (i32, i32) {
    %c0_i32 = arith.constant 0 : i32
    %c0_i32_0 = arith.constant 0 : i32
    return %arg0, %c0_i32 : i32, i32
  }
  func.func @transform_1(%arg0: i32) -> (i32, i32) {
    %c0_i32 = arith.constant 0 : i32
    %c0_i32_0 = arith.constant 0 : i32
    return %arg0, %c0_i32 : i32, i32
  }
}

</mosaic_0001>

<bundles_post_ra>
// kernel: tpu_custom_call.1
= control target key start
LH: loop header
LB: loop body
LE: loop exit
PB: predicated region body
PF: predicated region fallthrough
CT: control target
= control target key end

     0   :  { %6 = vsyncpa [#allocation3], 0  ;;  %s140_s0 = inlined_call_operand.hbm [shape: f32[2,1024], index: 0, kind: input, shape index: {}]   ;;  %s141_s1 = inlined_call_operand.hbm [shape: f32[2,1024], index: 1, kind: output, shape index: {}]  }
   0x1   :  { %7 = vsyncpa [#allocation4], 0  ;;  %s104_s6 = smov [#allocation2]   ;;  %s56_s10 = scalar_lea.hbm %s140_s0, 256 }
   0x2   :  { %s14_s7 = sshll.u32 %s104_s6, 4  ;;  %p57_p0 = scmp.ne.s32.totalorder %s140_s0, %s56_s10  ;;  %s15_s7 = int_to_ptr.vmem [resolvable:$true] %s14_s7 }
   0x3   :  { %p60_p1 = scmp.lt.u32.totalorder %s56_s10, %s140_s0 }
   0x5   :  { %p62_p2 = pnand %p60_p1, %p57_p0 }
   0x7   :  { %65 = shalt.err (!%p62_p2)
}
   0x8   :  { %s66_s15 = scalar_lea.vmem %s15_s7, 256  ;;  %p71_p4 = scmp.lt.s32.totalorder %s15_s7, %s15_s7 }
   0x9   :  { %p67_p3 = scmp.ne.s32.totalorder %s15_s7, %s66_s15  ;;  %p72_p5 = scmp.lt.s32.totalorder %s66_s15, %s66_s15 }
   0xb   :  { %p73_p6 = por %p72_p5, %p71_p4 }
   0xd   :  { %p74_p7 = pnand %p73_p6, %p67_p3 }
   0xf   :  { %77 = shalt.err (!%p74_p7)
}
  0x10   :  { %17 = dma.hbm_to_vmem [thread:$0]  %s140_s0, 256, %s15_s7, [#allocation3]  }
  0x11   :  { %100 = dma.done.wait [#allocation3], 256  }
  0x12   :  { %101 = vsyncadd [#allocation3], 4294967040  ;;  %v21_v0 = vld [vmem:[#allocation2] sm:$0xff]  ;;  %v22_v1 = vld [vmem:[#allocation2 + $0x8] sm:$0xff]  ;;  %s105_s18 = smov [#allocation5]  }
  0x13   :  { %v23_v2 = vmul.f32 0.5, %v21_v0  ;;  %v24_v3 = vmul.f32 0.5, %v22_v1  ;;  %s41_s19 = sshll.u32 %s105_s18, 4  ;;  %s42_s19 = int_to_ptr.vmem [resolvable:$true] %s41_s19 }
  0x14   :  { %s78_s0 = scalar_lea.vmem %s42_s19, 256  ;;  %p83_p9 = scmp.lt.s32.totalorder %s42_s19, %s42_s19 }
  0x15   :  { %52 = vtanh.f32 %v23_v2  ;;  %p79_p8 = scmp.ne.s32.totalorder %s42_s19, %s78_s0  ;;  %p84_p10 = scmp.lt.s32.totalorder %s78_s0, %s78_s0 }
  0x16   :  { %54 = vtanh.f32 %v24_v3 }
  0x17   :  { %p85_p11 = por %p84_p10, %p83_p9 }
  0x19   :  { %p86_p12 = pnand %p85_p11, %p79_p8 }
  0x1f   :  { %v53_v4 = vpop.eup %52 }
  0x20   :  { %v55_v5 = vpop.eup %54  ;;  %v27_v6 = vmul.f32 0.5, %v53_v4 }
  0x21   :  { %v28_v7 = vmul.f32 0.5, %v55_v5 }
  0x22   :  { %v29_v8 = vadd.f32 0.5, %v27_v6 }
  0x23   :  { %v30_v9 = vadd.f32 0.5, %v28_v7 }
  0x24   :  { %v31_v10 = vmul.f32 %v29_v8, %v21_v0 }
  0x25   :  { %v32_v11 = vmul.f32 %v30_v9, %v22_v1 }
  0x26   :  { %33 = vst [vmem:[#allocation5] sm:$0xff] %v31_v10 }
  0x27   :  { %34 = vst [vmem:[#allocation5 + $0x8] sm:$0xff] %v32_v11 }
  0x28   :  { %89 = shalt.err (!%p86_p12)
}
  0x29   :  { %s90_s22 = scalar_lea.hbm %s141_s1, 256 }
  0x2a   :  { %p91_p13 = scmp.ne.s32.totalorder %s141_s1, %s90_s22  ;;  %p94_p0 = scmp.lt.u32.totalorder %s90_s22, %s141_s1 }
  0x2c   :  { %p96_p1 = pnand %p94_p0, %p91_p13 }
  0x2e   :  { %99 = shalt.err (!%p96_p1)
}
  0x2f   :  { %44 = dma.vmem_to_hbm [thread:$0]  %s42_s19, 256, %s141_s1, [#allocation4]  }
  0x30   :  { %102 = dma.done.wait [#allocation4], 256  }
  0x31   :  { %103 = vsyncadd [#allocation4], 4294967040 }
  0x32   :  { %48 = vsyncpa [#allocation3], 1 }
  0x33   :  { %49 = vsyncpa [#allocation4], 1 }

</bundles_post_ra>
